<compile_context>
chip_gen: v5e
topology: v5e:2x2
jax: 0.10.0
libtpu: 0.0.40
codegen_flags: <defaults>
</compile_context>

<pallas_src>
import functools
import math

import jax
import jax.numpy as jnp
from jax.experimental import pallas as pl
from jax.experimental.pallas import tpu as pltpu


def _kl_smooth_kernel(xs_ref, xe_ref, lab_ref, out_ref, *,
                      num_tokens, eps, conf, qlogq, n_valid, tile_n):
    """One row tile: KL(log_softmax(x) || smoothed one-hot), mean over T, summed over rows."""
    labs = lab_ref[...]                                            # (tile_n, 2) int32
    # Hoisted column iota, shared by both logit tiles.
    col = jax.lax.broadcasted_iota(jnp.int32, (tile_n, num_tokens), 1)

    def row_loss(x_ref, lab):                                      # lab: (tile_n, 1)
        x = x_ref[...].astype(jnp.float32)                         # (tile_n, T)
        m = jnp.max(x, axis=-1, keepdims=True)
        lse = m + jnp.log(jnp.sum(jnp.exp(x - m), axis=-1, keepdims=True))
        # Fused weighted reduction: sum_t q_t*x_t with q_t = eps + (conf-eps)*onehot.
        w = jnp.where(col == lab, conf, eps)
        qx = jnp.sum(w * x, axis=-1, keepdims=True)
        # mean_t q_t*(log q_t - log_softmax(x)_t) = (qlogq + lse - qx) / T
        return (qlogq + lse - qx) / num_tokens

    loss = row_loss(xs_ref, labs[:, 0:1]) + row_loss(xe_ref, labs[:, 1:2])  # (tile_n,1)

    # Mask rows past the true row count (ragged trailing tile; select, so padded-row
    # garbage/NaN cannot propagate), then reduce to one per-tile partial sum.
    row_ids = (pl.program_id(0) * tile_n +
               jax.lax.broadcasted_iota(jnp.int32, loss.shape, 0))
    partial = jnp.sum(jnp.where(row_ids < n_valid, loss, 0.0))

    # Lane-dense (8, 128) output block (distinct block per grid step):
    # partial sum at [0, 0], zeros elsewhere -> unmasked full-vreg store.
    r = jax.lax.broadcasted_iota(jnp.int32, (8, 128), 0)
    c = jax.lax.broadcasted_iota(jnp.int32, (8, 128), 1)
    out_ref[...] = jnp.where((r == 0) & (c == 0), partial, 0.0)


def _default_vmem_limit_bytes():
    """Scoped-VMEM budget: ~3/4 of physical (capped), 48 MiB fallback (v7x-safe)."""
    try:
        cap = getattr(pltpu.get_tpu_info(), "vmem_capacity_bytes", None)
    except Exception:
        cap = None
    if not cap:
        return 48 * 1024 * 1024
    return int(min(cap * 3 // 4, 96 * 1024 * 1024))


def _choose_tile_n(n_rows, num_tokens, dtype, vmem_limit_bytes):
    """Largest row tile within the VMEM budget, rebalanced for >= 2 tiles when possible."""
    itemsize = jnp.dtype(dtype).itemsize
    # Sublane granularity: f32 -> 8, bf16 -> 16, int8/fp8 -> 32 rows.
    granule = max(8, 32 // itemsize)
    # Per-row VMEM bytes (double buffering already included):
    #   2 logits inputs x 2 buffers x T x itemsize
    # + 1 packed-label input x 2 buffers x 128 lanes x 4 B ((tile_n, 2) pads to 128 lanes)
    # (output is a fixed (8,128) block per step -> negligible, not per-row)
    per_row = 2 * (2 * num_tokens * itemsize) + (2 * 128 * 4)
    budget = int(0.8 * vmem_limit_bytes)          # headroom for compiler scratch only
    tile = max(granule, (budget // per_row) // granule * granule)

    rows_rounded = ((n_rows + granule - 1) // granule) * granule
    tile = min(tile, rows_rounded)

    # Prefer >= 2 tiles (when there is enough work) so a "parallel" grid split can
    # keep both v7x TensorCores busy, and rebalance so the trailing tile isn't tiny.
    n_tiles = (n_rows + tile - 1) // tile
    if n_tiles == 1 and rows_rounded >= 2 * granule:
        n_tiles = 2
    balanced = (n_rows + n_tiles - 1) // n_tiles
    balanced = ((balanced + granule - 1) // granule) * granule
    return max(granule, min(tile, balanced))


def nmt_norm_criterion(output_s, output_e, target_s, target_e,
                       label_smoothing=0.1, tile_n=None, vmem_limit_bytes=None):
    """Pallas implementation of NMTNORMCritierion.forward (label_smoothing > 0 path)."""
    assert 0.0 < label_smoothing < 1.0, "only the smoothed (KLDiv) path is supported"
    B, J, T = output_s.shape
    assert T > 1, "label smoothing needs at least 2 classes (eps = ls / (T - 1))"
    conf = 1.0 - label_smoothing
    eps = label_smoothing / (T - 1)
    # sum_t q_t * log(q_t): (T-1) entries at eps, one entry at conf.
    qlogq = (T - 1) * eps * math.log(eps) + conf * math.log(conf)

    BJ = B * J
    # Contiguous reshapes are free; logits keep their dtype (upcast in-register).
    xs = output_s.reshape(BJ, T)
    xe = output_e.reshape(BJ, T)
    # Pack the two tiny label vectors into one (BJ, 2) int32 input.
    labels = jnp.stack(
        [target_s[:, :, 0].reshape(BJ), target_e[:, :, 1].reshape(BJ)],
        axis=-1).astype(jnp.int32)

    if vmem_limit_bytes is None:
        vmem_limit_bytes = _default_vmem_limit_bytes()
    if tile_n is None:
        tile_n = _choose_tile_n(BJ, T, xs.dtype, vmem_limit_bytes)
    n_tiles = pl.cdiv(BJ, tile_n)

    kernel = functools.partial(
        _kl_smooth_kernel,
        num_tokens=T, eps=eps, conf=conf, qlogq=qlogq,
        n_valid=BJ, tile_n=tile_n)

    itemsize = jnp.dtype(xs.dtype).itemsize
    cost = pl.CostEstimate(
        flops=int(7 * 2 * BJ * T),
        transcendentals=int(2 * BJ * T),
        bytes_accessed=int(2 * BJ * T * itemsize + BJ * 2 * 4 + n_tiles * 8 * 128 * 4))

    out = pl.pallas_call(
        kernel,
        out_shape=jax.ShapeDtypeStruct((n_tiles * 8, 128), jnp.float32),
        grid_spec=pltpu.PrefetchScalarGridSpec(
            num_scalar_prefetch=0,
            grid=(n_tiles,),
            in_specs=[pl.BlockSpec((tile_n, T), lambda i: (i, 0)),
                      pl.BlockSpec((tile_n, T), lambda i: (i, 0)),
                      pl.BlockSpec((tile_n, 2), lambda i: (i, 0))],
            out_specs=pl.BlockSpec((8, 128), lambda i: (i, 0))),
        compiler_params=pltpu.CompilerParams(
            dimension_semantics=("parallel",),
            vmem_limit_bytes=int(vmem_limit_bytes)),
        cost_estimate=cost,
    )(xs, xe, labels)

    # sum_j [mean_B(start_j) + mean_B(end_j)] / J  ==  (sum over all rows) / (B*J)
    return jnp.sum(out) / (B * J)


def _reference(output_s, output_e, target_s, target_e, label_smoothing):
    """Pure-JAX mirror of the PyTorch module (label_smoothing > 0 path)."""
    B, J, T = output_s.shape
    conf = 1.0 - label_smoothing
    eps = label_smoothing / (T - 1)

    def crit(pred, lab):
        s = jax.nn.log_softmax(pred.astype(jnp.float32), axis=1)
        q = jnp.full((pred.shape[0], T), eps, dtype=jnp.float32)
        q = q.at[jnp.arange(pred.shape[0]), lab].set(conf)
        kl = q * (jnp.log(q) - s)               # KLDivLoss(reduction='none')
        return jnp.mean(kl, axis=1)

    loss = 0.0
    for idx in range(J):
        loss += crit(output_s[:, idx], target_s[:, idx, 0]).mean()
        loss += crit(output_e[:, idx], target_e[:, idx, 1]).mean()
    return loss / J


if __name__ == "__main__":
    label_smoothing = 0.1
    key = jax.random.PRNGKey(0)
    k1, k2, k3, k4, k5, k6, k7, k8 = jax.random.split(key, 8)

    # Case 1: small shape consistent with the module (B, J, T) / (B, J, 2).
    B, J, T = 2, 4, 128
    output_s = jax.random.normal(k1, (B, J, T), dtype=jnp.float32)
    output_e = jax.random.normal(k2, (B, J, T), dtype=jnp.float32)
    target_s = jax.random.randint(k3, (B, J, 2), 0, T, dtype=jnp.int32)
    target_e = jax.random.randint(k4, (B, J, 2), 0, T, dtype=jnp.int32)

    loss = jax.block_until_ready(
        nmt_norm_criterion(output_s, output_e, target_s, target_e,
                           label_smoothing=label_smoothing))
    ref = _reference(output_s, output_e, target_s, target_e, label_smoothing)
    assert jnp.allclose(loss, ref, rtol=1e-5, atol=1e-5), (loss, ref)

    # Case 2: multi-step grid with a ragged trailing tile (BJ=20, tile_n=8 -> 3 tiles,
    # last tile has 4 valid rows) to lock in the in-kernel masking path.
    B2, J2, T2 = 2, 10, 256
    o_s2 = jax.random.normal(k5, (B2, J2, T2), dtype=jnp.float32)
    o_e2 = jax.random.normal(k6, (B2, J2, T2), dtype=jnp.float32)
    t_s2 = jax.random.randint(k7, (B2, J2, 2), 0, T2, dtype=jnp.int32)
    t_e2 = jax.random.randint(k8, (B2, J2, 2), 0, T2, dtype=jnp.int32)
    loss2 = jax.block_until_ready(
        nmt_norm_criterion(o_s2, o_e2, t_s2, t_e2,
                           label_smoothing=label_smoothing, tile_n=8))
    ref2 = _reference(o_s2, o_e2, t_s2, t_e2, label_smoothing)
    assert jnp.allclose(loss2, ref2, rtol=1e-5, atol=1e-5), (loss2, ref2)

    print("KERNEL_OK")
</pallas_src>

<mosaic_0001>
module attributes {stable_mosaic.version = 11 : i64} {
  func.func @_kl_smooth_kernel(%arg0: i32, %arg1: memref<8x128xf32, #tpu.memory_space<vmem>>, %arg2: memref<8x128xf32, #tpu.memory_space<vmem>>, %arg3: memref<8x2xi32, #tpu.memory_space<vmem>>, %arg4: memref<8x128xf32, #tpu.memory_space<vmem>>) attributes {dimension_semantics = [#tpu.dimension_semantics<parallel>], iteration_bounds = array<i64: 1>, scalar_prefetch = 0 : i64, scratch_operands = 0 : i64, tpu.core_type = #tpu.core_type<tc>, window_params = [{transform_indices = @transform_0, window_bounds = array<i64: 8, 128>}, {transform_indices = @transform_1, window_bounds = array<i64: 8, 128>}, {transform_indices = @transform_2, window_bounds = array<i64: 8, 2>}, {transform_indices = @transform_3, window_bounds = array<i64: 8, 128>}]} {
    %c0 = arith.constant 0 : index
    %c0_0 = arith.constant 0 : index
    %0 = vector.load %arg3[%c0, %c0_0] : memref<8x2xi32, #tpu.memory_space<vmem>>, vector<8x2xi32>
    %1 = tpu.iota {dimensions = array<i32: 1>} : vector<8x128xi32>
    %2 = vector.extract_strided_slice %0 {offsets = [0, 0], sizes = [8, 1], strides = [1, 1]} : vector<8x2xi32> to vector<8x1xi32>
    %c0_1 = arith.constant 0 : index
    %c0_2 = arith.constant 0 : index
    %3 = vector.load %arg1[%c0_1, %c0_2] : memref<8x128xf32, #tpu.memory_space<vmem>>, vector<8x128xf32>
    %cst = arith.constant dense<0xFF800000> : vector<8xf32>
    %4 = vector.multi_reduction <maximumf>, %3, %cst [1] : vector<8x128xf32> to vector<8xf32>
    %5 = vector.shape_cast %4 : vector<8xf32> to vector<8x1xf32>
    %6 = vector.broadcast %5 : vector<8x1xf32> to vector<8x128xf32>
    %7 = arith.subf %3, %6 : vector<8x128xf32>
    %8 = math.exp %7 : vector<8x128xf32>
    %cst_3 = arith.constant dense<0.000000e+00> : vector<8xf32>
    %9 = vector.multi_reduction <add>, %8, %cst_3 [1] : vector<8x128xf32> to vector<8xf32>
    %10 = vector.shape_cast %9 : vector<8xf32> to vector<8x1xf32>
    %11 = math.log %10 : vector<8x1xf32>
    %12 = arith.addf %5, %11 : vector<8x1xf32>
    %13 = vector.broadcast %2 : vector<8x1xi32> to vector<8x128xi32>
    %14 = arith.cmpi eq, %1, %13 : vector<8x128xi32>
    %cst_4 = arith.constant 0.899999976 : f32
    %cst_5 = arith.constant 7.87401571E-4 : f32
    %15 = vector.broadcast %cst_4 : f32 to vector<8x128xf32>
    %16 = vector.broadcast %cst_5 : f32 to vector<8x128xf32>
    %17 = arith.select %14, %15, %16 : vector<8x128xi1>, vector<8x128xf32>
    %18 = arith.mulf %17, %3 : vector<8x128xf32>
    %cst_6 = arith.constant dense<0.000000e+00> : vector<8xf32>
    %19 = vector.multi_reduction <add>, %18, %cst_6 [1] : vector<8x128xf32> to vector<8xf32>
    %20 = vector.shape_cast %19 : vector<8xf32> to vector<8x1xf32>
    %cst_7 = arith.constant -0.809501707 : f32
    %21 = vector.broadcast %cst_7 : f32 to vector<8x1xf32>
    %22 = arith.addf %21, %12 : vector<8x1xf32>
    %23 = arith.subf %22, %20 : vector<8x1xf32>
    %cst_8 = arith.constant 1.280000e+02 : f32
    %24 = vector.broadcast %cst_8 : f32 to vector<8x1xf32>
    %25 = arith.divf %23, %24 : vector<8x1xf32>
    %26 = vector.extract_strided_slice %0 {offsets = [0, 1], sizes = [8, 1], strides = [1, 1]} : vector<8x2xi32> to vector<8x1xi32>
    %c0_9 = arith.constant 0 : index
    %c0_10 = arith.constant 0 : index
    %27 = vector.load %arg2[%c0_9, %c0_10] : memref<8x128xf32, #tpu.memory_space<vmem>>, vector<8x128xf32>
    %cst_11 = arith.constant dense<0xFF800000> : vector<8xf32>
    %28 = vector.multi_reduction <maximumf>, %27, %cst_11 [1] : vector<8x128xf32> to vector<8xf32>
    %29 = vector.shape_cast %28 : vector<8xf32> to vector<8x1xf32>
    %30 = vector.broadcast %29 : vector<8x1xf32> to vector<8x128xf32>
    %31 = arith.subf %27, %30 : vector<8x128xf32>
    %32 = math.exp %31 : vector<8x128xf32>
    %cst_12 = arith.constant dense<0.000000e+00> : vector<8xf32>
    %33 = vector.multi_reduction <add>, %32, %cst_12 [1] : vector<8x128xf32> to vector<8xf32>
    %34 = vector.shape_cast %33 : vector<8xf32> to vector<8x1xf32>
    %35 = math.log %34 : vector<8x1xf32>
    %36 = arith.addf %29, %35 : vector<8x1xf32>
    %37 = vector.broadcast %26 : vector<8x1xi32> to vector<8x128xi32>
    %38 = arith.cmpi eq, %1, %37 : vector<8x128xi32>
    %cst_13 = arith.constant 0.899999976 : f32
    %cst_14 = arith.constant 7.87401571E-4 : f32
    %39 = vector.broadcast %cst_13 : f32 to vector<8x128xf32>
    %40 = vector.broadcast %cst_14 : f32 to vector<8x128xf32>
    %41 = arith.select %38, %39, %40 : vector<8x128xi1>, vector<8x128xf32>
    %42 = arith.mulf %41, %27 : vector<8x128xf32>
    %cst_15 = arith.constant dense<0.000000e+00> : vector<8xf32>
    %43 = vector.multi_reduction <add>, %42, %cst_15 [1] : vector<8x128xf32> to vector<8xf32>
    %44 = vector.shape_cast %43 : vector<8xf32> to vector<8x1xf32>
    %cst_16 = arith.constant -0.809501707 : f32
    %45 = vector.broadcast %cst_16 : f32 to vector<8x1xf32>
    %46 = arith.addf %45, %36 : vector<8x1xf32>
    %47 = arith.subf %46, %44 : vector<8x1xf32>
    %cst_17 = arith.constant 1.280000e+02 : f32
    %48 = vector.broadcast %cst_17 : f32 to vector<8x1xf32>
    %49 = arith.divf %47, %48 : vector<8x1xf32>
    %50 = arith.addf %25, %49 : vector<8x1xf32>
    %c8_i32 = arith.constant 8 : i32
    %51 = arith.muli %arg0, %c8_i32 : i32
    %52 = tpu.iota {dimensions = array<i32: 0>} : vector<8x1xi32>
    %53 = vector.broadcast %51 : i32 to vector<8x1xi32>
    %54 = arith.addi %53, %52 : vector<8x1xi32>
    %c8_i32_18 = arith.constant 8 : i32
    %55 = vector.broadcast %c8_i32_18 : i32 to vector<8x1xi32>
    %56 = arith.cmpi slt, %54, %55 : vector<8x1xi32>
    %cst_19 = arith.constant 0.000000e+00 : f32
    %57 = vector.broadcast %cst_19 : f32 to vector<8x1xf32>
    %58 = arith.select %56, %50, %57 : vector<8x1xi1>, vector<8x1xf32>
    %59 = vector.shape_cast %58 : vector<8x1xf32> to vector<1x8x1xf32>
    %cst_20 = arith.constant dense<0.000000e+00> : vector<1xf32>
    %60 = vector.multi_reduction <add>, %59, %cst_20 [1, 2] : vector<1x8x1xf32> to vector<1xf32>
    %61 = vector.shape_cast %60 : vector<1xf32> to vector<1x1x1xf32>
    %62 = vector.extract %61[0, 0, 0] : f32 from vector<1x1x1xf32>
    %63 = tpu.iota {dimensions = array<i32: 0>} : vector<8x128xi32>
    %64 = tpu.iota {dimensions = array<i32: 1>} : vector<8x128xi32>
    %c0_i32 = arith.constant 0 : i32
    %65 = vector.broadcast %c0_i32 : i32 to vector<8x128xi32>
    %66 = arith.cmpi eq, %63, %65 : vector<8x128xi32>
    %c0_i32_21 = arith.constant 0 : i32
    %67 = vector.broadcast %c0_i32_21 : i32 to vector<8x128xi32>
    %68 = arith.cmpi eq, %64, %67 : vector<8x128xi32>
    %69 = arith.andi %66, %68 : vector<8x128xi1>
    %cst_22 = arith.constant 0.000000e+00 : f32
    %70 = vector.broadcast %62 : f32 to vector<8x128xf32>
    %71 = vector.broadcast %cst_22 : f32 to vector<8x128xf32>
    %72 = arith.select %69, %70, %71 : vector<8x128xi1>, vector<8x128xf32>
    %c0_23 = arith.constant 0 : index
    %c0_24 = arith.constant 0 : index
    %73 = vector.load %arg4[%c0_23, %c0_24] : memref<8x128xf32, #tpu.memory_space<vmem>>, vector<8x128xf32>
    tpu.vector_store %arg4[%c0_23, %c0_24], %72 {strides = array<i32>} : memref<8x128xf32, #tpu.memory_space<vmem>>, vector<8x128xf32>,
    return
  }
  func.func @transform_0(%arg0: i32) -> (i32, i32) {
    %c0_i32 = arith.constant 0 : i32
    %c0_i32_0 = arith.constant 0 : i32
    return %arg0, %c0_i32 : i32, i32
  }
  func.func @transform_1(%arg0: i32) -> (i32, i32) {
    %c0_i32 = arith.constant 0 : i32
    %c0_i32_0 = arith.constant 0 : i32
    return %arg0, %c0_i32 : i32, i32
  }
  func.func @transform_2(%arg0: i32) -> (i32, i32) {
    %c0_i32 = arith.constant 0 : i32
    %c0_i32_0 = arith.constant 0 : i32
    return %arg0, %c0_i32 : i32, i32
  }
  func.func @transform_3(%arg0: i32) -> (i32, i32) {
    %c0_i32 = arith.constant 0 : i32
    %c0_i32_0 = arith.constant 0 : i32
    return %arg0, %c0_i32 : i32, i32
  }
}

</mosaic_0001>

<bundles_post_ra>
// kernel: tpu_custom_call.1
= control target key start
LH: loop header
LB: loop body
LE: loop exit
PB: predicated region body
PF: predicated region fallthrough
CT: control target
= control target key end

     0   :  { %8 = vsyncpa [#allocation3], 0  ;;  %s243_s0 = inlined_call_operand.vmem [shape: f32[8,128], index: 0, kind: input, shape index: {}]   ;;  %s244_s1 = inlined_call_operand.hbm [shape: f32[8,128], index: 1, kind: input, shape index: {}]   ;;  %s245_s2 = inlined_call_operand.vmem [shape: s32[8,2], index: 2, kind: input, shape index: {}]   ;;  %s246_s3 = inlined_call_operand.hbm [shape: f32[8,128], index: 3, kind: output, shape index: {}]  }
   0x1   :  { %9 = vsyncpa [#allocation4], 0  ;;  %s17_s14 = sshll.u32 %s244_s1, 4  ;;  %s198_s15 = smov [#allocation2]   ;;  %s18_s14 = int_to_ptr.hbm [resolvable:$true] %s17_s14 }
   0x2   :  { %s19_s16 = sshll.u32 %s198_s15, 4  ;;  %s20_s16 = int_to_ptr.vmem [resolvable:$true] %s19_s16 }
   0x3   :  { %22 = dma.hbm_to_vmem [thread:$0]  %s18_s14, 128, %s20_s16, [#allocation3]  }
   0x4   :  { %194 = dma.done.wait [#allocation3], 128  }
   0x5   :  { %195 = vsyncadd [#allocation3], 4294967168  ;;  %v199_v0 = vmov 0   ;;  %v200_v1 = vmov 1   ;;  %v32_v2 = vld [vmem:[%s243_s0] sm:$0xff]  ;;  %v30_v5 = vlaneseq  ;;  %v202_v22 = vmov 128.0  }
   0x6   :  { %133 = vset.pattern.permute.xlu1 %v199_v0  ;;  %135 = vset.pattern.permute.xlu0 %v200_v1  ;;  %v29_v3 = vld [vmem:[%s245_s2] sm:$0xff]  ;;  %v201_v10 = vmov 0.0007874016   ;;  %vm91_vm3 = vcmask 7168   ;;  %s203_s0 = smov [#allocation5]   ;;  %s115_s22 = sshll.u32 %s246_s3, 4  ;;  %s116_s22 = int_to_ptr.hbm [resolvable:$true] %s115_s22 }
   0x7   :  { %33 = vmax.xlane.f32.xlu0 %v32_v2  ;;  %44 = vperm.xlu1 %133, %v29_v3   ;;  %v61_v4 = vld [vmem:[#allocation2] sm:$0xff]  ;;  %v234_v6 = vand.u32 127, %v30_v5  ;;  %v86_v54 = vshrl.u32 %v30_v5, 7  ;;  %s113_s1 = sshll.u32 %s203_s0, 4  ;;  %s114_s1 = int_to_ptr.vmem [resolvable:$true] %s113_s1 }
   0x9   :  { %vm102_vm4 = vcmp.eq.s32.totalorder %v86_v54, 0  ;;  %vm103_vm5 = vcmp.eq.s32.totalorder %v234_v6, 0 }
   0xa   :  { %vm104_vm6 = vmand %vm102_vm4, %vm103_vm5 }
   0xf   :  { %62 = vmax.xlane.f32.xlu0 %v61_v4  ;;  %134 = vset.pattern.permute.xlu1 %v200_v1 }
  0x10   :  { %73 = vperm.xlu1 %134, %v29_v3  }
  0x79   :  { %v45_v7 = vpop.permute.xlu1 %44 }
  0x7a   :  { %v34_v8 = vpop.xlane.xlu0 %33  ;;  %vm46_vm0 = vcmp.eq.s32.totalorder %v234_v6, %v45_v7 }
  0x7b   :  { %v35_v9 = vsub.f32 %v32_v2, %v34_v8  ;;  %v47_v11 = vsel %vm46_vm0, 0.9, %v201_v10 }
  0x7c   :  { %v48_v12 = vmul.f32 %v47_v11, %v32_v2 }
  0x7d   :  { %v36_v13 = vmul.f32 1.442695, %v35_v9 }
  0x7e   :  { %49 = vadd.xlane.f32.xlu0 %v48_v12 }
  0x7f   :  { %136 = vpow2.f32 %v36_v13 }
  0x82   :  { %v63_v14 = vpop.xlane.xlu0 %62  ;;  %v74_v15 = vpop.permute.xlu1 %73 }
  0x83   :  { %v64_v16 = vsub.f32 %v61_v4, %v63_v14  ;;  %vm75_vm1 = vcmp.eq.s32.totalorder %v234_v6, %v74_v15 }
  0x84   :  { %v76_v17 = vsel %vm75_vm1, 0.9, %v201_v10 }
  0x85   :  { %v137_v18 = vpop.eup %136  ;;  %v65_v19 = vmul.f32 1.442695, %v64_v16  ;;  %v77_v20 = vmul.f32 %v76_v17, %v61_v4 }
  0x86   :  { %38 = vadd.xlane.f32.xlu2 %v137_v18 }
  0x87   :  { %138 = vpow2.f32 %v65_v19  ;;  %78 = vadd.xlane.f32.xlu1 %v77_v20 }
  0x88   :  { %140 = vrcp.f32 %v202_v22 }
  0x8d   :  { %v139_v21 = vpop.eup %138 }
  0x8e   :  { %67 = vadd.xlane.f32.xlu2 %v139_v21  ;;  %v141_v24 = vpop.eup %140 }
  0x8f   :  { %v54_v25 = vmul.f32 128.0, %v141_v24  ;;  %vm58_vm2 = vweird.f32 %v141_v24 }
  0x91   :  { %v55_v29 = vsub.f32 1.0, %v54_v25 }
  0x93   :  { %v56_v31 = vmul.f32 %v141_v24, %v55_v29 }
  0x95   :  { %v57_v35 = vadd.f32 %v141_v24, %v56_v31 }
  0x97   :  { %v59_v41 = vsel %vm58_vm2, %v141_v24, %v57_v35 }
  0xf1   :  { %v50_v36 = vpop.xlane.xlu0 %49 }
  0xf9   :  { %v39_v23 = vpop.xlane.xlu2 %38 }
  0xfa   :  { %142 = vlog2.f32 %v39_v23  ;;  %v79_v38 = vpop.xlane.xlu1 %78 }
 0x100   :  { %v143_v26 = vpop.eup %142 }
 0x101   :  { %v41_v27 = vmul.f32 0.6931472, %v143_v26  ;;  %v68_v28 = vpop.xlane.xlu2 %67 }
 0x102   :  { %144 = vlog2.f32 %v68_v28 }
 0x103   :  { %v42_v30 = vadd.f32 %v41_v27, %v34_v8 }
 0x105   :  { %v51_v34 = vadd.f32 -0.8095017, %v42_v30 }
 0x107   :  { %v52_v39 = vsub.f32 %v51_v34, %v50_v36 }
 0x108   :  { %v145_v32 = vpop.eup %144 }
 0x109   :  { %v70_v33 = vmul.f32 0.6931472, %v145_v32  ;;  %v60_v43 = vmul.f32 %v59_v41, %v52_v39 }
 0x10b   :  { %v71_v37 = vadd.f32 %v70_v33, %v63_v14 }
 0x10d   :  { %v80_v40 = vadd.f32 -0.8095017, %v71_v37 }
 0x10f   :  { %v81_v42 = vsub.f32 %v80_v40, %v79_v38 }
 0x111   :  { %v82_v44 = vmul.f32 %v81_v42, %v59_v41 }
 0x113   :  { %v83_v45 = vadd.f32 %v82_v44, %v60_v43 }
 0x115   :  { %v92_v46 = vsel %vm91_vm3, %v83_v45, 0.0 }
 0x116   :  { %93 = vadd.xlane.f32.xlu2 %v92_v46 }
 0x189   :  { %v94_v47 = vpop.xlane.xlu2 %93 }
 0x18a   :  { %v95_v48 = vrot.slane %v94_v47, 4 }
 0x18c   :  { %v96_v49 = vadd.f32 %v95_v48, %v94_v47 }
 0x18e   :  { %v97_v50 = vrot.slane %v96_v49, 2 }
 0x190   :  { %v98_v51 = vadd.f32 %v97_v50, %v96_v49 }
 0x192   :  { %v99_v52 = vrot.slane %v98_v51, 1 }
 0x194   :  { %v100_v53 = vadd.f32 %v99_v52, %v98_v51 }
 0x196   :  { %125 = vpush %v100_v53 }
 0x1c7   :  { %s126_s23 = spop %125 }
 0x1c8   :  { %v105_v55 = vstv %s126_s23 }
 0x1c9   :  { %v106_v56 = vsel %vm104_vm6, %v105_v55, 0.0 }
 0x1ca   :  { %107 = vst [vmem:[#allocation5] sm:$0xff] %v106_v56 }
 0x1cb   :  { %118 = dma.vmem_to_hbm [thread:$0]  %s114_s1, 128, %s116_s22, [#allocation4]  }
 0x1cc   :  { %196 = dma.done.wait [#allocation4], 128  }
 0x1cd   :  { %197 = vsyncadd [#allocation4], 4294967168 }
 0x1ce   :  { %123 = vsyncpa [#allocation3], 1 }
 0x1cf   :  { %124 = vsyncpa [#allocation4], 1 }

</bundles_post_ra>
